<compile_context>
chip_gen: v7x
topology: tpu7x:2x2x1
jax: 0.10.0
libtpu: 0.0.40
codegen_flags: <defaults>
</compile_context>

<pallas_src>
import functools

import jax
import jax.numpy as jnp
from jax.experimental import pallas as pl
from jax.experimental.pallas import tpu as pltpu


def se_kernel(x_ref, w1_ref, b1_ref, w2_ref, b2_ref, o_ref, *, inv_hw):
    # x_ref: (TB, C, HWp) block; padded lanes (if any) are zero.
    x = x_ref[...]

    # Squeeze: global average pool over the (lane) spatial axis.
    # Padded lanes are zero, so sum * (1/HW_true) is the exact mean.
    y = jnp.sum(x, axis=-1).astype(jnp.float32) * inv_hw          # (TB, C)

    # Excitation: FC -> ReLU -> FC -> Sigmoid (weights pre-transposed (in, out)).
    h = jnp.dot(y, w1_ref[...], preferred_element_type=jnp.float32) + b1_ref[...]
    h = jnp.maximum(h, 0.0)                                       # (TB, hidden)
    z = jnp.dot(h, w2_ref[...], preferred_element_type=jnp.float32) + b2_ref[...]
    # Numerically stable sigmoid: 0.5 * (tanh(z/2) + 1)  (tanh runs on the EUP).
    s = 0.5 * (jnp.tanh(0.5 * z) + 1.0)                           # (TB, C)

    # Scale: broadcast per-channel gate over the spatial (lane) axis.
    o_ref[...] = (x * s[:, :, None].astype(x.dtype)).astype(o_ref.dtype)


def se_layer(x_nchw, w1, b1, w2, b2, *, batch_tile=None,
             vmem_budget_bytes=24 * 1024 * 1024):
    """x_nchw: (B, C, H, W). w1: (C, C//r), b1: (C//r,), w2: (C//r, C), b2: (C,)."""
    B, C, H, W = x_nchw.shape
    hidden = w1.shape[1]
    HW = H * W
    # Lane-dense last dim: pad spatial up to a multiple of 128.
    HWp = ((HW + 127) // 128) * 128

    x_flat = x_nchw.reshape(B, C, HW)
    if HWp != HW:
        x_flat = jnp.pad(x_flat, ((0, 0), (0, 0), (0, HWp - HW)))

    b1_2d = b1.reshape(1, hidden)
    b2_2d = b2.reshape(1, C)

    dbytes = jnp.dtype(x_flat.dtype).itemsize
    block_bytes = C * HWp * dbytes  # one batch element's slab

    if batch_tile is None:
        # In + out blocks, each double-buffered -> ~4 live copies of one block.
        batch_tile = max(1, min(B, vmem_budget_bytes // (4 * block_bytes)))
    TB = int(batch_tile)
    grid = (pl.cdiv(B, TB),)

    weight_bytes = (w1.size + b1_2d.size + w2.size + b2_2d.size) * 4
    live_bytes = 4 * TB * block_bytes + 2 * weight_bytes
    # ~30% headroom over the computed live set, capped at v7x physical VMEM.
    vmem_limit = min(int(live_bytes * 1.3) + (1 << 20), 64 * 1024 * 1024)

    x_spec = pl.BlockSpec((TB, C, HWp), lambda b: (b, 0, 0))
    out_spec = pl.BlockSpec((TB, C, HWp), lambda b: (b, 0, 0))
    # Weights/biases: full-array blocks, constant index_map -> resident in VMEM.
    w1_spec = pl.BlockSpec((C, hidden), lambda b: (0, 0))
    b1_spec = pl.BlockSpec((1, hidden), lambda b: (0, 0))
    w2_spec = pl.BlockSpec((hidden, C), lambda b: (0, 0))
    b2_spec = pl.BlockSpec((1, C), lambda b: (0, 0))

    cost = pl.CostEstimate(
        flops=int(2 * B * C * HW + 4 * B * C * hidden + 2 * B * (C + hidden)),
        transcendentals=int(B * C),
        bytes_accessed=int(2 * B * C * HWp * dbytes + weight_bytes),
    )

    out = pl.pallas_call(
        functools.partial(se_kernel, inv_hw=1.0 / HW),
        out_shape=jax.ShapeDtypeStruct((B, C, HWp), x_flat.dtype),
        grid=grid,
        in_specs=[x_spec, w1_spec, b1_spec, w2_spec, b2_spec],
        out_specs=out_spec,
        compiler_params=pltpu.CompilerParams(
            dimension_semantics=("parallel",),
            vmem_limit_bytes=vmem_limit,
        ),
        cost_estimate=cost,
    )(x_flat, w1, b1_2d, w2, b2_2d)

    if HWp != HW:
        out = out[:, :, :HW]
    return out.reshape(B, C, H, W)


def reference_se(x_nchw, w1, b1, w2, b2):
    y = jnp.mean(x_nchw, axis=(2, 3))              # (B, C)
    h = jnp.maximum(y @ w1 + b1, 0.0)              # (B, hidden)
    s = jax.nn.sigmoid(h @ w2 + b2)                # (B, C)
    return x_nchw * s[:, :, None, None]


if __name__ == "__main__":
    B, C, H, W = 2, 64, 8, 8
    reduction = 16
    hidden = C // reduction  # 4

    key = jax.random.PRNGKey(0)
    kx, k1, k2, k3, k4 = jax.random.split(key, 5)

    x = jax.random.normal(kx, (B, C, H, W), dtype=jnp.float32)
    # PyTorch Linear weight is (out, in); stored pre-transposed (in, out) for y @ W.
    bound1 = 1.0 / jnp.sqrt(C)
    bound2 = 1.0 / jnp.sqrt(hidden)
    w1 = jax.random.uniform(k1, (C, hidden), jnp.float32, -bound1, bound1)
    b1 = jax.random.uniform(k2, (hidden,), jnp.float32, -bound1, bound1)
    w2 = jax.random.uniform(k3, (hidden, C), jnp.float32, -bound2, bound2)
    b2 = jax.random.uniform(k4, (C,), jnp.float32, -bound2, bound2)

    out = se_layer(x, w1, b1, w2, b2)
    out = jax.block_until_ready(out)

    ref = reference_se(x, w1, b1, w2, b2)
    assert out.shape == (B, C, H, W)
    assert jnp.allclose(out, ref, atol=1e-5, rtol=1e-5), "mismatch vs reference"
    print("KERNEL_OK")
</pallas_src>

<mosaic_0001>
module attributes {stable_mosaic.version = 11 : i64} {
  func.func @se_kernel(%arg0: i32, %arg1: memref<2x64x128xf32, #tpu.memory_space<vmem>>, %arg2: memref<64x4xf32, #tpu.memory_space<vmem>>, %arg3: memref<1x4xf32, #tpu.memory_space<vmem>>, %arg4: memref<4x64xf32, #tpu.memory_space<vmem>>, %arg5: memref<1x64xf32, #tpu.memory_space<vmem>>, %arg6: memref<2x64x128xf32, #tpu.memory_space<vmem>>) attributes {dimension_semantics = [#tpu.dimension_semantics<parallel>], iteration_bounds = array<i64: 1>, scalar_prefetch = 0 : i64, scratch_operands = 0 : i64, tpu.core_type = #tpu.core_type<tc>, window_params = [{transform_indices = @transform_0, window_bounds = array<i64: 2, 64, 128>}, {pipeline_mode = #tpu.pipeline_mode<synchronous>, transform_indices = @transform_1, window_bounds = array<i64: 64, 4>}, {pipeline_mode = #tpu.pipeline_mode<synchronous>, transform_indices = @transform_2, window_bounds = array<i64: 1, 4>}, {pipeline_mode = #tpu.pipeline_mode<synchronous>, transform_indices = @transform_3, window_bounds = array<i64: 4, 64>}, {pipeline_mode = #tpu.pipeline_mode<synchronous>, transform_indices = @transform_4, window_bounds = array<i64: 1, 64>}, {transform_indices = @transform_5, window_bounds = array<i64: 2, 64, 128>}]} {
    %c0 = arith.constant 0 : index
    %c0_0 = arith.constant 0 : index
    %c0_1 = arith.constant 0 : index
    %0 = vector.load %arg1[%c0, %c0_0, %c0_1] : memref<2x64x128xf32, #tpu.memory_space<vmem>>, vector<2x64x128xf32>
    %cst = arith.constant dense<0.000000e+00> : vector<2x64xf32>
    %1 = vector.multi_reduction <add>, %0, %cst [2] : vector<2x64x128xf32> to vector<2x64xf32>
    %cst_2 = arith.constant 1.562500e-02 : f32
    %2 = vector.broadcast %cst_2 : f32 to vector<2x64xf32>
    %3 = arith.mulf %1, %2 : vector<2x64xf32>
    %c0_3 = arith.constant 0 : index
    %c0_4 = arith.constant 0 : index
    %4 = vector.load %arg2[%c0_3, %c0_4] : memref<64x4xf32, #tpu.memory_space<vmem>>, vector<64x4xf32>
    %cst_5 = arith.constant dense<0.000000e+00> : vector<2x4xf32>
    %5 = tpu.matmul %3, %4, %cst_5 {dimension_numbers = #tpu.dot_dimension_numbers<[1], [0], [0], [1], [0, 0, 1, 1], [], []>} : vector<2x64xf32>, vector<64x4xf32>, vector<2x4xf32> -> vector<2x4xf32>
    %c0_6 = arith.constant 0 : index
    %c0_7 = arith.constant 0 : index
    %6 = vector.load %arg3[%c0_6, %c0_7] : memref<1x4xf32, #tpu.memory_space<vmem>>, vector<1x4xf32>
    %7 = vector.broadcast %6 : vector<1x4xf32> to vector<2x4xf32>
    %8 = arith.addf %5, %7 : vector<2x4xf32>
    %cst_8 = arith.constant 0.000000e+00 : f32
    %9 = vector.broadcast %cst_8 : f32 to vector<2x4xf32>
    %10 = arith.maximumf %8, %9 : vector<2x4xf32>
    %c0_9 = arith.constant 0 : index
    %c0_10 = arith.constant 0 : index
    %11 = vector.load %arg4[%c0_9, %c0_10] : memref<4x64xf32, #tpu.memory_space<vmem>>, vector<4x64xf32>
    %cst_11 = arith.constant dense<0.000000e+00> : vector<2x64xf32>
    %12 = tpu.matmul %10, %11, %cst_11 {dimension_numbers = #tpu.dot_dimension_numbers<[1], [0], [0], [1], [0, 0, 1, 1], [], []>} : vector<2x4xf32>, vector<4x64xf32>, vector<2x64xf32> -> vector<2x64xf32>
    %c0_12 = arith.constant 0 : index
    %c0_13 = arith.constant 0 : index
    %13 = vector.load %arg5[%c0_12, %c0_13] : memref<1x64xf32, #tpu.memory_space<vmem>>, vector<1x64xf32>
    %14 = vector.broadcast %13 : vector<1x64xf32> to vector<2x64xf32>
    %15 = arith.addf %12, %14 : vector<2x64xf32>
    %cst_14 = arith.constant 5.000000e-01 : f32
    %16 = vector.broadcast %cst_14 : f32 to vector<2x64xf32>
    %17 = arith.mulf %16, %15 : vector<2x64xf32>
    %18 = math.tanh %17 : vector<2x64xf32>
    %cst_15 = arith.constant 1.000000e+00 : f32
    %19 = vector.broadcast %cst_15 : f32 to vector<2x64xf32>
    %20 = arith.addf %18, %19 : vector<2x64xf32>
    %cst_16 = arith.constant 5.000000e-01 : f32
    %21 = vector.broadcast %cst_16 : f32 to vector<2x64xf32>
    %22 = arith.mulf %21, %20 : vector<2x64xf32>
    %23 = vector.shape_cast %22 : vector<2x64xf32> to vector<2x64x1xf32>
    %24 = vector.broadcast %23 : vector<2x64x1xf32> to vector<2x64x128xf32>
    %25 = arith.mulf %0, %24 : vector<2x64x128xf32>
    %c0_17 = arith.constant 0 : index
    %c0_18 = arith.constant 0 : index
    %c0_19 = arith.constant 0 : index
    %26 = vector.load %arg6[%c0_17, %c0_18, %c0_19] : memref<2x64x128xf32, #tpu.memory_space<vmem>>, vector<2x64x128xf32>
    tpu.vector_store %arg6[%c0_17, %c0_18, %c0_19], %25 {strides = array<i32>} : memref<2x64x128xf32, #tpu.memory_space<vmem>>, vector<2x64x128xf32>,
    return
  }
  func.func @transform_0(%arg0: i32) -> (i32, i32, i32) {
    %c0_i32 = arith.constant 0 : i32
    %c0_i32_0 = arith.constant 0 : i32
    %c0_i32_1 = arith.constant 0 : i32
    return %arg0, %c0_i32, %c0_i32_0 : i32, i32, i32
  }
  func.func @transform_1(%arg0: i32) -> (i32, i32) {
    %c0_i32 = arith.constant 0 : i32
    %c0_i32_0 = arith.constant 0 : i32
    %c0_i32_1 = arith.constant 0 : i32
    return %c0_i32, %c0_i32_0 : i32, i32
  }
  func.func @transform_2(%arg0: i32) -> (i32, i32) {
    %c0_i32 = arith.constant 0 : i32
    %c0_i32_0 = arith.constant 0 : i32
    %c0_i32_1 = arith.constant 0 : i32
    return %c0_i32, %c0_i32_0 : i32, i32
  }
  func.func @transform_3(%arg0: i32) -> (i32, i32) {
    %c0_i32 = arith.constant 0 : i32
    %c0_i32_0 = arith.constant 0 : i32
    %c0_i32_1 = arith.constant 0 : i32
    return %c0_i32, %c0_i32_0 : i32, i32
  }
  func.func @transform_4(%arg0: i32) -> (i32, i32) {
    %c0_i32 = arith.constant 0 : i32
    %c0_i32_0 = arith.constant 0 : i32
    %c0_i32_1 = arith.constant 0 : i32
    return %c0_i32, %c0_i32_0 : i32, i32
  }
  func.func @transform_5(%arg0: i32) -> (i32, i32, i32) {
    %c0_i32 = arith.constant 0 : i32
    %c0_i32_0 = arith.constant 0 : i32
    %c0_i32_1 = arith.constant 0 : i32
    return %arg0, %c0_i32, %c0_i32_0 : i32, i32, i32
  }
}

</mosaic_0001>

<bundles_post_ra>
// kernel: tpu_custom_call.1
= control target key start
LH: loop header
LB: loop body
LE: loop exit
PB: predicated region body
PF: predicated region fallthrough
CT: control target
= control target key end

     0   :  { %10 = vsyncpa [#allocation3], 0  ;;  %s806_s0 = inlined_call_operand.hbm [shape: f32[2,64,128], index: 0, kind: input, shape index: {}]   ;;  %s807_s1 = inlined_call_operand.vmem [shape: f32[64,4], index: 1, kind: input, shape index: {}]   ;;  %s808_s2 = inlined_call_operand.vmem [shape: f32[1,4], index: 2, kind: input, shape index: {}]   ;;  %s809_s3 = inlined_call_operand.vmem [shape: f32[4,64], index: 3, kind: input, shape index: {}]   ;;  %s810_s4 = inlined_call_operand.vmem [shape: f32[1,64], index: 4, kind: input, shape index: {}]   ;;  %s811_s5 = inlined_call_operand.hbm [shape: f32[2,64,128], index: 5, kind: output, shape index: {}]  }
   0x1   :  { %11 = vsyncpa [#allocation4], 0  ;;  %s618_s18 = smov [#allocation2]   ;;  %s570_s22 = scalar_lea.hbm %s806_s0, 2048 }
   0x2   :  { %s17_s19 = sshll.u32 %s618_s18, 4  ;;  %p571_p0 = scmp.ne.s32.totalorder %s806_s0, %s570_s22  ;;  %s18_s19 = int_to_ptr.vmem [resolvable:$true] %s17_s19 }
   0x3   :  { %p574_p1 = scmp.lt.u32.totalorder %s570_s22, %s806_s0 }
   0x5   :  { %p576_p2 = pnand %p574_p1, %p571_p0 }
   0x7   :  { %579 = shalt.err (!%p576_p2)
}
   0x8   :  { %s580_s27 = scalar_lea.vmem %s18_s19, 2048  ;;  %p585_p4 = scmp.lt.s32.totalorder %s18_s19, %s18_s19 }
   0x9   :  { %p581_p3 = scmp.ne.s32.totalorder %s18_s19, %s580_s27  ;;  %p586_p5 = scmp.lt.s32.totalorder %s580_s27, %s580_s27 }
   0xb   :  { %p587_p6 = por %p586_p5, %p585_p4 }
   0xd   :  { %p588_p7 = pnand %p587_p6, %p581_p3 }
   0xf   :  { %591 = shalt.err (!%p588_p7)
}
  0x10   :  { %s619_s28 = smov 128   ;;  %s620_s29 = smov 8  }
  0x11   :  { %23 = dma.hbm_to_vmem [thread:$0]  %s806_s0, 2048, %s18_s19, [#allocation3], %s619_s28, %s619_s28, %s620_s29  }
  0x12   :  { %614 = dma.done.wait [#allocation3], 2048  }
  0x13   :  { %615 = vsyncadd [#allocation3], 4294965248  ;;  %v670_v0 = vld [vmem:[#allocation2 + $0x40] sm:$0xff]  ;;  %v676_v2 = vld [vmem:[#allocation2 + $0x48] sm:$0xff]  ;;  %v621_v19 = vmov 0.0|0.0   ;;  %vm622_vm0 = vmmov 0   ;;  %v130_v34 = vlaneseq }
  0x14   :  { %v672_v1 = vld [vmem:[#allocation2] sm:$0xff]  ;;  %67 = vadd.xlane.f32.xlu1 %v670_v0  ;;  %v678_v3 = vld [vmem:[#allocation2 + $0x8] sm:$0xff]  ;;  %v682_v4 = vld [vmem:[#allocation2 + $0x50] sm:$0xff]  ;;  %549 = vmatprep.subr.bf16.mxu0 %v621_v19  ;;  %v623_v29 = vmov 0.0   ;;  %vm141_vm1 = vcmask 130112   ;;  %vm148_vm2 = vcmask 195712  }
  0x15   :  { %51 = vadd.xlane.f32.xlu0 %v672_v1  ;;  %v684_v5 = vld [vmem:[#allocation2 + $0x10] sm:$0xff]  ;;  %v688_v6 = vld [vmem:[#allocation2 + $0x58] sm:$0xff]  ;;  %v694_v8 = vld [vmem:[#allocation2 + $0x60] sm:$0xff]  ;;  %541 = vmatprep.mubr.msk.f32.mxu0 %vm622_vm0, %v623_v29  ;;  %v131_v37 = vand.u32 127, %v130_v34  ;;  %v742_v38 = vshrl.u32 %v130_v34, 7  ;;  %vm155_vm3 = vcmask 261312  }
  0x16   :  { %v690_v7 = vld [vmem:[#allocation2 + $0x18] sm:$0xff]  ;;  %v696_v9 = vld [vmem:[#allocation2 + $0x20] sm:$0xff]  ;;  %v700_v10 = vld [vmem:[#allocation2 + $0x68] sm:$0xff]  ;;  %544 = vmatprep.subr.mxu1 %v623_v29  ;;  %546 = vmatprep.mubr.msk.f32.mxu1 %vm622_vm0, %v623_v29  ;;  %vm162_vm4 = vcmask 326912   ;;  %vm169_vm5 = vcmask 392512   ;;  %vm176_vm6 = vcmask 458112  }
  0x17   :  { %v702_v11 = vld [vmem:[#allocation2 + $0x28] sm:$0xff]  ;;  %v706_v12 = vld [vmem:[#allocation2 + $0x70] sm:$0xff]  ;;  %v712_v14 = vld [vmem:[#allocation2 + $0x78] sm:$0xff]  ;;  %v136_v41 = vadd.s32 4294967288, %v131_v37  ;;  %v143_v42 = vadd.s32 4294967280, %v131_v37  ;;  %v150_v43 = vadd.s32 4294967272, %v131_v37  ;;  %v134_v45 = vsub.s32 %v131_v37, %v742_v38 }
  0x18   :  { %69 = vadd.xlane.f32.xlu1 %v676_v2  ;;  %v708_v13 = vld [vmem:[#allocation2 + $0x30] sm:$0xff]  ;;  %v714_v15 = vld [vmem:[#allocation2 + $0x38] sm:$0xff]  ;;  %v99_v16 = vld [vmem:[%s807_s1] sm:$0xff]  ;;  %v157_v44 = vadd.s32 4294967264, %v131_v37  ;;  %v164_v50 = vadd.s32 4294967256, %v131_v37  ;;  %v171_v52 = vadd.s32 4294967248, %v131_v37 }
  0x19   :  { %53 = vadd.xlane.f32.xlu0 %v678_v3  ;;  %v100_v17 = vld [vmem:[%s807_s1 + $0x8] sm:$0xff]  ;;  %v101_v20 = vld [vmem:[%s807_s1 + $0x10] sm:$0xff]  ;;  %v102_v21 = vld [vmem:[%s807_s1 + $0x18] sm:$0xff]  ;;  %v139_v48 = vsub.s32 %v136_v41, %v742_v38  ;;  %v146_v49 = vsub.s32 %v143_v42, %v742_v38  ;;  %v153_v51 = vsub.s32 %v150_v43, %v742_v38  ;;  %vm183_vm7 = vcmask 523712  }
  0x1a   :  { %v550_v18 = vpack.c.bf16 %v100_v17, %v99_v16  ;;  %v553_v22 = vpack.c.bf16 %v102_v21, %v101_v20  ;;  %v103_v23 = vld [vmem:[%s807_s1 + $0x20] sm:$0xff]  ;;  %v104_v24 = vld [vmem:[%s807_s1 + $0x28] sm:$0xff]  ;;  %v105_v26 = vld [vmem:[%s807_s1 + $0x30] sm:$0xff]  ;;  %v160_v55 = vsub.s32 %v157_v44, %v742_v38  ;;  %v167_v16 = vsub.s32 %v164_v50, %v742_v38 }
  0x1b   :  { %v556_v25 = vpack.c.bf16 %v104_v24, %v103_v23  ;;  %v106_v27 = vld [vmem:[%s807_s1 + $0x38] sm:$0xff]  ;;  %v178_v20 = vadd.s32 4294967240, %v131_v37  ;;  %vm224_vm8 = vcmask 1041409   ;;  %vm226_vm9 = vcmask 523264  }
  0x1c   :  { %71 = vadd.xlane.f32.xlu1 %v682_v4  ;;  %551 = vmatpush3.bf16.msra.mxu0 %v550_v18  ;;  %v559_v28 = vpack.c.bf16 %v106_v27, %v105_v26  ;;  %vm312_vm10 = vcmask 1043456   ;;  %vm308_vm11 = vcmask 31744  }
  0x1d   :  { %55 = vadd.xlane.f32.xlu0 %v684_v5  ;;  %552 = vmatprep.subr.bf16.mxu0 %v621_v19 }
  0x20   :  { %73 = vadd.xlane.f32.xlu1 %v688_v6  ;;  %554 = vmatpush3.bf16.msra.mxu0 %v553_v22 }
  0x21   :  { %57 = vadd.xlane.f32.xlu0 %v690_v7  ;;  %555 = vmatprep.subr.bf16.mxu0 %v621_v19 }
  0x24   :  { %75 = vadd.xlane.f32.xlu1 %v694_v8  ;;  %557 = vmatpush3.bf16.msra.mxu0 %v556_v25 }
  0x25   :  { %59 = vadd.xlane.f32.xlu0 %v696_v9  ;;  %558 = vmatprep.subr.bf16.mxu0 %v621_v19  ;;  %v174_v19 = vsub.s32 %v171_v52, %v742_v38 }
  0x28   :  { %77 = vadd.xlane.f32.xlu1 %v700_v10  ;;  %560 = vmatpush3.bf16.msra.mxu0 %v559_v28 }
  0x29   :  { %61 = vadd.xlane.f32.xlu0 %v702_v11 }
  0x2c   :  { %79 = vadd.xlane.f32.xlu1 %v706_v12 }
  0x2d   :  { %63 = vadd.xlane.f32.xlu0 %v708_v13 }
  0x30   :  { %81 = vadd.xlane.f32.xlu1 %v712_v14 }
  0x31   :  { %65 = vadd.xlane.f32.xlu0 %v714_v15 }
  0xa1   :  { %v68_v30 = vpop.xlane.xlu1 %67 }
  0xa2   :  { %v52_v31 = vpop.xlane.xlu0 %51  ;;  %v91_v56 = vmul.f32 0.015625, %v68_v30 }
  0xa3   :  { %v83_v57 = vmul.f32 0.015625, %v52_v31 }
  0xa4   :  { %v188_v25 = vrot.slane %v91_v56, %v134_v45 }
  0xa5   :  { %v70_v32 = vpop.xlane.xlu1 %69  ;;  %v135_v26 = vrot.slane %v83_v57, %v134_v45 }
  0xa6   :  { %v54_v33 = vpop.xlane.xlu0 %53  ;;  %v92_v53 = vmul.f32 0.015625, %v70_v32 }
  0xa7   :  { %v84_v54 = vmul.f32 0.015625, %v54_v33 }
  0xa8   :  { %v192_v21 = vrot.slane %v92_v53, %v139_v48 }
  0xa9   :  { %v72_v35 = vpop.xlane.xlu1 %71  ;;  %v140_v22 = vrot.slane %v84_v54, %v139_v48 }
  0xaa   :  { %v56_v36 = vpop.xlane.xlu0 %55  ;;  %v93_v58 = vmul.f32 0.015625, %v72_v35  ;;  %v193_v37 = vsel %vm141_vm1, %v192_v21, %v188_v25 }
  0xab   :  { %v85_v59 = vmul.f32 0.015625, %v56_v36 }
  0xac   :  { %v197_v27 = vrot.slane %v93_v58, %v146_v49 }
  0xad   :  { %v74_v39 = vpop.xlane.xlu1 %73  ;;  %v147_v28 = vrot.slane %v85_v59, %v146_v49 }
  0xae   :  { %v58_v40 = vpop.xlane.xlu0 %57  ;;  %v94_v62 = vmul.f32 0.015625, %v74_v39  ;;  %v181_v39 = vsub.s32 %v178_v20, %v742_v38  ;;  %v198_v43 = vsel %vm148_vm2, %v197_v27, %v193_v37 }
  0xaf   :  { %v86_v63 = vmul.f32 0.015625, %v58_v40  ;;  %v142_v40 = vsel %vm141_vm1, %v140_v22, %v135_v26  ;;  %v511_v22 = vld [vmem:[%s810_s4] ss:$0 sm:$0xff] }
  0xb0   :  { %v202_v31 = vrot.slane %v94_v62, %v153_v51  ;;  %v149_v44 = vsel %vm148_vm2, %v147_v28, %v142_v40 }
  0xb1   :  { %v76_v46 = vpop.xlane.xlu1 %75  ;;  %v154_v32 = vrot.slane %v86_v63, %v153_v51 }
  0xb2   :  { %v60_v47 = vpop.xlane.xlu0 %59  ;;  %v95_v17 = vmul.f32 0.015625, %v76_v46  ;;  %v203_v49 = vsel %vm155_vm3, %v202_v31, %v198_v43 }
  0xb3   :  { %v87_v18 = vmul.f32 0.015625, %v60_v47  ;;  %v156_v50 = vsel %vm155_vm3, %v154_v32, %v149_v44  ;;  %v427_v32 = vsub.s32 1, %v742_v38 }
  0xb4   :  { %v207_v35 = vrot.slane %v95_v17, %v160_v55  ;;  %v509_v17 = vld [vmem:[%s808_s2] ss:$0 sm:$0xff]  ;;  %s624_s2 = smov [#allocation5]  }
  0xb5   :  { %v78_v60 = vpop.xlane.xlu1 %77  ;;  %v161_v36 = vrot.slane %v87_v18, %v160_v55 }
  0xb6   :  { %v62_v61 = vpop.xlane.xlu0 %61  ;;  %v96_v23 = vmul.f32 0.015625, %v78_v60  ;;  %v208_v53 = vsel %vm162_vm4, %v207_v35, %v203_v49 }
  0xb7   :  { %v88_v24 = vmul.f32 0.015625, %v62_v61  ;;  %v163_v54 = vsel %vm162_vm4, %v161_v36, %v156_v50 }
  0xb8   :  { %v212_v41 = vrot.slane %v96_v23, %v167_v16 }
  0xb9   :  { %v80_v29 = vpop.xlane.xlu1 %79  ;;  %v168_v42 = vrot.slane %v88_v24, %v167_v16  ;;  %v300_v16 = vld [vmem:[%s809_s3] sm:$0xf]  ;;  %s497_s3 = sshll.u32 %s624_s2, 4  ;;  %s498_s3 = int_to_ptr.vmem [resolvable:$true] %s497_s3 }
  0xba   :  { %v64_v30 = vpop.xlane.xlu0 %63  ;;  %v97_v33 = vmul.f32 0.015625, %v80_v29  ;;  %v213_v55 = vsel %vm169_vm5, %v212_v41, %v208_v53  ;;  %545 = vmatpush3.msk.msra.mxu1 %vm312_vm10, %v300_v16  ;;  %v392_v29 = vsub.s32 0, %v742_v38  ;;  %s592_s4 = scalar_lea.vmem %s498_s3, 2048  ;;  %p597_p9 = scmp.lt.s32.totalorder %s498_s3, %s498_s3 }
  0xbb   :  { %v89_v34 = vmul.f32 0.015625, %v64_v30  ;;  %v170_v56 = vsel %vm169_vm5, %v168_v42, %v163_v54  ;;  %p593_p8 = scmp.ne.s32.totalorder %s498_s3, %s592_s4  ;;  %p598_p10 = scmp.lt.s32.totalorder %s592_s4, %s592_s4 }
  0xbc   :  { %v217_v45 = vrot.slane %v97_v33, %v174_v19 }
  0xbd   :  { %v175_v46 = vrot.slane %v89_v34, %v174_v19  ;;  %v82_v47 = vpop.xlane.xlu1 %81  ;;  %p599_p11 = por %p598_p10, %p597_p9 }
  0xbe   :  { %v66_v48 = vpop.xlane.xlu0 %65  ;;  %v98_v51 = vmul.f32 0.015625, %v82_v47  ;;  %v218_v59 = vsel %vm176_vm6, %v217_v45, %v213_v55 }
  0xbf   :  { %v90_v52 = vmul.f32 0.015625, %v66_v48  ;;  %v177_v60 = vsel %vm176_vm6, %v175_v46, %v170_v56  ;;  %p600_p12 = pnand %p599_p11, %p593_p8 }
  0xc0   :  { %v222_v57 = vrot.slane %v98_v51, %v181_v39 }
  0xc1   :  { %v182_v58 = vrot.slane %v90_v52, %v181_v39 }
  0xc2   :  { %v223_v62 = vsel %vm183_vm7, %v222_v57, %v218_v59 }
  0xc3   :  { %v184_v61 = vsel %vm183_vm7, %v182_v58, %v177_v60 }
  0xc4   :  { %v225_v63 = vsel %vm224_vm8, %v223_v62, %v184_v61 }
  0xc5   :  { %542 = vmatmul.mubr.msk.f32.vlgmr.msra.gmra.mrb[0].mxu0 %vm226_vm9, %v225_v63 }
 0x198   :  { %v295_v18 = vpop.f32.mrb[0].mxu0 }
 0x199   :  { %v296_v19 = vadd.f32 %v509_v17, %v295_v18  ;;  %v543_v20 = vpop.f32.mrb[1].mxu0 }
 0x19b   :  { %v299_v21 = vmax.f32 %v296_v19, 0.0 }
 0x19d   :  { %547 = vmatmul.mubr.msk.f32.vlgmr.msra.gmra.mrb[0].mxu1 %vm308_vm11, %v299_v21 }
 0x270   :  { %v382_v23 = vpop.f32.mrb[0].mxu1 }
 0x271   :  { %v383_v24 = vadd.f32 %v511_v22, %v382_v23  ;;  %v548_v25 = vpop.f32.mrb[1].mxu1 }
 0x273   :  { %v386_v26 = vmul.f32 0.5, %v383_v24 }
 0x275   :  { %568 = vtanh.f32 %v386_v26 }
 0x27f   :  { %v569_v27 = vpop.eup %568 }
 0x280   :  { %v388_v28 = vadd.f32 1.0, %v569_v27 }
 0x282   :  { %v389_v30 = vmul.f32 0.5, %v388_v28 }
 0x284   :  { %v393_v31 = vrot.slane %v389_v30, %v392_v29  ;;  %v428_v33 = vrot.slane %v389_v30, %v427_v32 }
 0x286   :  { %399 = vbcast.lane.b32.xlu1 %v393_v31, 264  ;;  %395 = vbcast.lane.b32.xlu0 %v393_v31, 256 }
 0x28a   :  { %403 = vbcast.lane.b32.xlu1 %v393_v31, 272  ;;  %411 = vbcast.lane.b32.xlu0 %v393_v31, 288 }
 0x28e   :  { %407 = vbcast.lane.b32.xlu1 %v393_v31, 280  ;;  %419 = vbcast.lane.b32.xlu0 %v393_v31, 304 }
 0x292   :  { %415 = vbcast.lane.b32.xlu1 %v393_v31, 296  ;;  %430 = vbcast.lane.b32.xlu0 %v428_v33, 256 }
 0x296   :  { %423 = vbcast.lane.b32.xlu1 %v393_v31, 312  ;;  %438 = vbcast.lane.b32.xlu0 %v428_v33, 272 }
 0x29a   :  { %434 = vbcast.lane.b32.xlu1 %v428_v33, 264  ;;  %446 = vbcast.lane.b32.xlu0 %v428_v33, 288 }
 0x29e   :  { %442 = vbcast.lane.b32.xlu1 %v428_v33, 280  ;;  %454 = vbcast.lane.b32.xlu0 %v428_v33, 304 }
 0x2a2   :  { %450 = vbcast.lane.b32.xlu1 %v428_v33, 296 }
 0x2a6   :  { %458 = vbcast.lane.b32.xlu1 %v428_v33, 312 }
 0x2f8   :  { %v400_v34 = vpop.permute.xlu1 %399  ;;  %v396_v35 = vpop.permute.xlu0 %395 }
 0x2f9   :  { %v461_v36 = vmul.f32 %v400_v34, %v678_v3  ;;  %v460_v39 = vmul.f32 %v396_v35, %v672_v1 }
 0x2fb   :  { %477 = vst [vmem:[#allocation5 + $0x8] sm:$0xff] %v461_v36  ;;  %476 = vst [vmem:[#allocation5] sm:$0xff] %v460_v39 }
 0x2fc   :  { %v404_v38 = vpop.permute.xlu1 %403  ;;  %v412_v37 = vpop.permute.xlu0 %411 }
 0x2fd   :  { %v462_v40 = vmul.f32 %v404_v38, %v684_v5  ;;  %v464_v41 = vmul.f32 %v412_v37, %v696_v9 }
 0x2ff   :  { %478 = vst [vmem:[#allocation5 + $0x10] sm:$0xff] %v462_v40  ;;  %480 = vst [vmem:[#allocation5 + $0x20] sm:$0xff] %v464_v41 }
 0x300   :  { %v408_v42 = vpop.permute.xlu1 %407  ;;  %v420_v43 = vpop.permute.xlu0 %419 }
 0x301   :  { %v463_v44 = vmul.f32 %v408_v42, %v690_v7  ;;  %v466_v45 = vmul.f32 %v420_v43, %v708_v13 }
 0x303   :  { %479 = vst [vmem:[#allocation5 + $0x18] sm:$0xff] %v463_v44  ;;  %482 = vst [vmem:[#allocation5 + $0x30] sm:$0xff] %v466_v45 }
 0x304   :  { %v416_v3 = vpop.permute.xlu1 %415  ;;  %v431_v1 = vpop.permute.xlu0 %430 }
 0x305   :  { %v465_v46 = vmul.f32 %v416_v3, %v702_v11  ;;  %v468_v47 = vmul.f32 %v431_v1, %v670_v0 }
 0x307   :  { %481 = vst [vmem:[#allocation5 + $0x28] sm:$0xff] %v465_v46  ;;  %484 = vst [vmem:[#allocation5 + $0x40] sm:$0xff] %v468_v47 }
 0x308   :  { %v424_v5 = vpop.permute.xlu1 %423  ;;  %v439_v9 = vpop.permute.xlu0 %438 }
 0x309   :  { %v467_v48 = vmul.f32 %v424_v5, %v714_v15  ;;  %v470_v49 = vmul.f32 %v439_v9, %v682_v4 }
 0x30b   :  { %483 = vst [vmem:[#allocation5 + $0x38] sm:$0xff] %v467_v48  ;;  %486 = vst [vmem:[#allocation5 + $0x50] sm:$0xff] %v470_v49 }
 0x30c   :  { %v435_v7 = vpop.permute.xlu1 %434  ;;  %v447_v13 = vpop.permute.xlu0 %446 }
 0x30d   :  { %v469_v50 = vmul.f32 %v435_v7, %v676_v2  ;;  %v472_v51 = vmul.f32 %v447_v13, %v694_v8 }
 0x30f   :  { %485 = vst [vmem:[#allocation5 + $0x48] sm:$0xff] %v469_v50  ;;  %488 = vst [vmem:[#allocation5 + $0x60] sm:$0xff] %v472_v51 }
 0x310   :  { %v443_v11 = vpop.permute.xlu1 %442  ;;  %v455_v0 = vpop.permute.xlu0 %454 }
 0x311   :  { %v471_v52 = vmul.f32 %v443_v11, %v688_v6  ;;  %v474_v53 = vmul.f32 %v455_v0, %v706_v12 }
 0x313   :  { %487 = vst [vmem:[#allocation5 + $0x58] sm:$0xff] %v471_v52  ;;  %490 = vst [vmem:[#allocation5 + $0x70] sm:$0xff] %v474_v53 }
 0x314   :  { %v451_v15 = vpop.permute.xlu1 %450 }
 0x315   :  { %v473_v4 = vmul.f32 %v451_v15, %v700_v10 }
 0x317   :  { %489 = vst [vmem:[#allocation5 + $0x68] sm:$0xff] %v473_v4 }
 0x318   :  { %v459_v54 = vpop.permute.xlu1 %458 }
 0x319   :  { %v475_v2 = vmul.f32 %v459_v54, %v712_v14 }
 0x31b   :  { %491 = vst [vmem:[#allocation5 + $0x78] sm:$0xff] %v475_v2 }
 0x31c   :  { %603 = shalt.err (!%p600_p12)
}
 0x31d   :  { %s604_s6 = scalar_lea.hbm %s811_s5, 2048 }
 0x31e   :  { %p605_p13 = scmp.ne.s32.totalorder %s811_s5, %s604_s6  ;;  %p608_p0 = scmp.lt.u32.totalorder %s604_s6, %s811_s5 }
 0x320   :  { %p610_p1 = pnand %p608_p0, %p605_p13 }
 0x322   :  { %613 = shalt.err (!%p610_p1)
}
 0x323   :  { %503 = dma.vmem_to_hbm [thread:$0]  %s498_s3, 2048, %s811_s5, [#allocation4], %s619_s28, %s619_s28, %s620_s29  }
 0x324   :  { %616 = dma.done.wait [#allocation4], 2048  }
 0x325   :  { %617 = vsyncadd [#allocation4], 4294965248 }
 0x326   :  { %507 = vsyncpa [#allocation3], 1 }
 0x327   :  { %508 = vsyncpa [#allocation4], 1 }

</bundles_post_ra>
